<compile_context>
chip_gen: v5e
topology: v5e:2x2
jax: 0.10.0
libtpu: 0.0.40
codegen_flags: <defaults>
</compile_context>

<pallas_src>
import math

import jax
import jax.numpy as jnp
from jax.experimental import pallas as pl
from jax.experimental.pallas import tpu as pltpu


# ----------------------------- fused SE kernel --------------------------------
def _se_kernel(x_ref, w1t_ref, b1_ref, w2_ref, b2_ref, o_ref):
    # x_ref / o_ref: (Nb, C, H*W)
    # w1t_ref: (C, Cr)  = W1.T   (W1 is nn.Linear(channel, channel//r).weight)
    # b1_ref : (1, Cr)
    # w2_ref : (C, Cr)  = W2     (nn.Linear(channel//r, channel).weight)
    # b2_ref : (1, C)
    nb, c, hw = x_ref.shape
    inv_hw = 1.0 / hw

    # Global average pool over the spatial (lane) axis, accumulated in f32.
    # The upcast slab is only live inside this reduce (short vreg live range).
    pooled = jnp.sum(x_ref[...].astype(jnp.float32), axis=-1) * inv_hw   # (Nb, C)

    # FC1: h[n, j] = relu(sum_c pooled[n, c] * W1[j, c] + b1[j])  -> (Nb, Cr)
    # Tiny contraction: broadcast-multiply + sublane reduce (VPU/XLU, no MXU).
    h = jnp.sum(pooled[:, :, None] * w1t_ref[...][None, :, :], axis=1)
    h = jnp.maximum(h + b1_ref[...], 0.0)                                # (Nb, Cr)

    # FC2: y[n, c] = sum_j W2[c, j] * h[n, j] + b2[c]             -> (Nb, C)
    y = jnp.sum(h[:, None, :] * w2_ref[...][None, :, :], axis=-1) + b2_ref[...]

    # torch.clamp(y, 0, 1); cast the per-channel scale ONCE to the store dtype
    # and do the dominant elementwise rescale in the native dtype (bf16-friendly
    # on v6e/v7x, f32 on f32 inputs).  x is re-read from VMEM (cheap vld).
    y = jnp.clip(y, 0.0, 1.0).astype(o_ref.dtype)                        # (Nb, C)
    o_ref[...] = x_ref[...] * y[:, :, None]


# ----------------------------- block-size selection ---------------------------
def _choose_batch_block(n, per_image_bytes, target_bytes=2 << 20):
    """Pick Nb images per grid step, targeting ~2 MiB of x per step."""
    nb = max(1, int(target_bytes // max(per_image_bytes, 1)))
    if n >= 2:
        nb = min(nb, n // 2)        # keep grid length >= 2 for v7x megacore
    nb = max(1, min(nb, n))
    while nb > 1 and n % nb != 0:   # avoid a ragged tail block
        nb -= 1
    return nb


# ------------------------------ parameter prep --------------------------------
def prepare_se_params(params):
    """One-time re-layout of the tiny FC weights for the kernel (hoisted out of
    the per-call forward path)."""
    cr, c = params["w1"].shape
    return {
        "w1_t": params["w1"].T,                # (C, Cr)
        "b1_row": params["b1"].reshape(1, cr),  # (1, Cr)
        "w2": params["w2"],                    # (C, Cr)
        "b2_row": params["b2"].reshape(1, c),   # (1, C)
    }


# --------------------------------- forward ------------------------------------
def se_layer_forward(x_nchw, prep):
    N, C, H, W = x_nchw.shape
    hw = H * W
    cr = prep["w1_t"].shape[1]

    # Free, contiguous reshape: (N, C, H, W) -> (N, C, H*W).
    x_flat = x_nchw.reshape(N, C, hw)

    itemsize = jnp.dtype(x_nchw.dtype).itemsize
    per_image_bytes = C * hw * itemsize
    nb = _choose_batch_block(N, per_image_bytes)
    block_bytes = nb * per_image_bytes

    param_bytes = sum(int(jnp.dtype(v.dtype).itemsize) * v.size for v in prep.values())
    # in-block + out-block, double-buffered, plus weights and slack; keep well
    # under v7x's 64 MiB physical VMEM while still raising v5e's 16 MiB default.
    vmem_limit = int(min(max(6 * block_bytes + param_bytes + (2 << 20), 32 << 20),
                         48 << 20))

    out_flat = pl.pallas_call(
        _se_kernel,
        out_shape=jax.ShapeDtypeStruct((N, C, hw), x_nchw.dtype),
        grid=(pl.cdiv(N, nb),),
        in_specs=[
            pl.BlockSpec((nb, C, hw), lambda n: (n, 0, 0)),   # x: Nb-image slab
            pl.BlockSpec((C, cr), lambda n: (0, 0)),          # W1.T
            pl.BlockSpec((1, cr), lambda n: (0, 0)),          # b1
            pl.BlockSpec((C, cr), lambda n: (0, 0)),          # W2
            pl.BlockSpec((1, C), lambda n: (0, 0)),           # b2
        ],
        out_specs=pl.BlockSpec((nb, C, hw), lambda n: (n, 0, 0)),
        compiler_params=pltpu.CompilerParams(
            dimension_semantics=("parallel",),
            vmem_limit_bytes=vmem_limit,
        ),
        # TODO(synk): if xprof still shows exposed DMA per step on v7x, add
        # pipeline_mode=pl.Buffered(3) on the x input/output BlockSpecs.
    )(x_flat, prep["w1_t"], prep["b1_row"], prep["w2"], prep["b2_row"])

    return out_flat.reshape(N, C, H, W)


# ------------------------------ pure-JAX reference ----------------------------
def se_layer_reference(x_nchw, params):
    pooled = jnp.mean(x_nchw, axis=(2, 3))                         # (N, C)
    h = jnp.maximum(pooled @ params["w1"].T + params["b1"], 0.0)   # (N, Cr)
    y = h @ params["w2"].T + params["b2"]                          # (N, C)
    y = jnp.clip(y, 0.0, 1.0)
    return x_nchw * y[:, :, None, None]


# --------------------------------- parameters ---------------------------------
def make_params(key, channel, reduction=4):
    cr = max(channel // reduction, 1)
    k1, k2, k3, k4 = jax.random.split(key, 4)
    # nn.Linear(channel, channel // reduction): weight (cr, channel), bias (cr,)
    w1 = jax.random.normal(k1, (cr, channel), jnp.float32) / math.sqrt(channel)
    b1 = jax.random.normal(k2, (cr,), jnp.float32) * 0.1
    # nn.Linear(channel // reduction, channel): weight (channel, cr), bias (channel,)
    w2 = jax.random.normal(k3, (channel, cr), jnp.float32) / math.sqrt(cr)
    b2 = jax.random.normal(k4, (channel,), jnp.float32) * 0.1
    return {"w1": w1, "b1": b1, "w2": w2, "b2": b2}


if __name__ == "__main__":
    # Small shapes consistent with the module: batch=2, channels=4, 16x16 spatial.
    N, C, H, W = 2, 4, 16, 16
    reduction = 4

    key = jax.random.PRNGKey(0)
    kx, kp = jax.random.split(key)
    x = jax.random.normal(kx, (N, C, H, W), jnp.float32)
    params = make_params(kp, C, reduction)
    prep = prepare_se_params(params)   # one-time weight re-layout (hoisted)

    out = se_layer_forward(x, prep)
    out = jax.block_until_ready(out)

    ref = se_layer_reference(x, params)
    assert out.shape == (N, C, H, W), out.shape
    assert jnp.allclose(out, ref, atol=1e-5, rtol=1e-5), "mismatch vs reference"

    print("KERNEL_OK")
</pallas_src>

<mosaic_0001>
module attributes {stable_mosaic.version = 11 : i64} {
  func.func @_se_kernel(%arg0: i32, %arg1: memref<1x4x256xf32, #tpu.memory_space<vmem>>, %arg2: memref<4x1xf32, #tpu.memory_space<vmem>>, %arg3: memref<1x1xf32, #tpu.memory_space<vmem>>, %arg4: memref<4x1xf32, #tpu.memory_space<vmem>>, %arg5: memref<1x4xf32, #tpu.memory_space<vmem>>, %arg6: memref<1x4x256xf32, #tpu.memory_space<vmem>>) attributes {dimension_semantics = [#tpu.dimension_semantics<parallel>], iteration_bounds = array<i64: 2>, scalar_prefetch = 0 : i64, scratch_operands = 0 : i64, tpu.core_type = #tpu.core_type<tc>, window_params = [{transform_indices = @transform_0, window_bounds = array<i64: 1, 4, 256>}, {pipeline_mode = #tpu.pipeline_mode<synchronous>, transform_indices = @transform_1, window_bounds = array<i64: 4, 1>}, {pipeline_mode = #tpu.pipeline_mode<synchronous>, transform_indices = @transform_2, window_bounds = array<i64: 1, 1>}, {pipeline_mode = #tpu.pipeline_mode<synchronous>, transform_indices = @transform_3, window_bounds = array<i64: 4, 1>}, {pipeline_mode = #tpu.pipeline_mode<synchronous>, transform_indices = @transform_4, window_bounds = array<i64: 1, 4>}, {transform_indices = @transform_5, window_bounds = array<i64: 1, 4, 256>}]} {
    %c0 = arith.constant 0 : index
    %c0_0 = arith.constant 0 : index
    %c0_1 = arith.constant 0 : index
    %0 = vector.load %arg1[%c0, %c0_0, %c0_1] : memref<1x4x256xf32, #tpu.memory_space<vmem>>, vector<1x4x256xf32>
    %cst = arith.constant dense<0.000000e+00> : vector<1x4xf32>
    %1 = vector.multi_reduction <add>, %0, %cst [2] : vector<1x4x256xf32> to vector<1x4xf32>
    %cst_2 = arith.constant 3.906250e-03 : f32
    %2 = vector.broadcast %cst_2 : f32 to vector<1x4xf32>
    %3 = arith.mulf %1, %2 : vector<1x4xf32>
    %4 = vector.shape_cast %3 : vector<1x4xf32> to vector<1x4x1xf32>
    %c0_3 = arith.constant 0 : index
    %c0_4 = arith.constant 0 : index
    %5 = vector.load %arg2[%c0_3, %c0_4] : memref<4x1xf32, #tpu.memory_space<vmem>>, vector<4x1xf32>
    %6 = vector.shape_cast %5 : vector<4x1xf32> to vector<1x4x1xf32>
    %7 = arith.mulf %4, %6 : vector<1x4x1xf32>
    %cst_5 = arith.constant dense<0.000000e+00> : vector<1x1xf32>
    %8 = vector.multi_reduction <add>, %7, %cst_5 [1] : vector<1x4x1xf32> to vector<1x1xf32>
    %c0_6 = arith.constant 0 : index
    %c0_7 = arith.constant 0 : index
    %9 = vector.load %arg3[%c0_6, %c0_7] : memref<1x1xf32, #tpu.memory_space<vmem>>, vector<1x1xf32>
    %10 = arith.addf %8, %9 : vector<1x1xf32>
    %cst_8 = arith.constant 0.000000e+00 : f32
    %11 = vector.broadcast %cst_8 : f32 to vector<1x1xf32>
    %12 = arith.maximumf %10, %11 : vector<1x1xf32>
    %13 = vector.shape_cast %12 : vector<1x1xf32> to vector<1x1x1xf32>
    %c0_9 = arith.constant 0 : index
    %c0_10 = arith.constant 0 : index
    %14 = vector.load %arg4[%c0_9, %c0_10] : memref<4x1xf32, #tpu.memory_space<vmem>>, vector<4x1xf32>
    %15 = vector.shape_cast %14 : vector<4x1xf32> to vector<1x4x1xf32>
    %16 = vector.broadcast %13 : vector<1x1x1xf32> to vector<1x4x1xf32>
    %17 = arith.mulf %16, %15 : vector<1x4x1xf32>
    %cst_11 = arith.constant dense<0.000000e+00> : vector<1x4xf32>
    %18 = vector.multi_reduction <add>, %17, %cst_11 [2] : vector<1x4x1xf32> to vector<1x4xf32>
    %c0_12 = arith.constant 0 : index
    %c0_13 = arith.constant 0 : index
    %19 = vector.load %arg5[%c0_12, %c0_13] : memref<1x4xf32, #tpu.memory_space<vmem>>, vector<1x4xf32>
    %20 = arith.addf %18, %19 : vector<1x4xf32>
    %cst_14 = arith.constant 0.000000e+00 : f32
    %cst_15 = arith.constant 1.000000e+00 : f32
    %21 = vector.broadcast %cst_14 : f32 to vector<1x4xf32>
    %22 = arith.maximumf %21, %20 : vector<1x4xf32>
    %23 = vector.broadcast %cst_15 : f32 to vector<1x4xf32>
    %24 = arith.minimumf %23, %22 : vector<1x4xf32>
    %c0_16 = arith.constant 0 : index
    %c0_17 = arith.constant 0 : index
    %c0_18 = arith.constant 0 : index
    %25 = vector.load %arg1[%c0_16, %c0_17, %c0_18] : memref<1x4x256xf32, #tpu.memory_space<vmem>>, vector<1x4x256xf32>
    %26 = vector.shape_cast %24 : vector<1x4xf32> to vector<1x4x1xf32>
    %27 = vector.broadcast %26 : vector<1x4x1xf32> to vector<1x4x256xf32>
    %28 = arith.mulf %25, %27 : vector<1x4x256xf32>
    %c0_19 = arith.constant 0 : index
    %c0_20 = arith.constant 0 : index
    %c0_21 = arith.constant 0 : index
    %29 = vector.load %arg6[%c0_19, %c0_20, %c0_21] : memref<1x4x256xf32, #tpu.memory_space<vmem>>, vector<1x4x256xf32>
    tpu.vector_store %arg6[%c0_19, %c0_20, %c0_21], %28 {strides = array<i32>} : memref<1x4x256xf32, #tpu.memory_space<vmem>>, vector<1x4x256xf32>,
    return
  }
  func.func @transform_0(%arg0: i32) -> (i32, i32, i32) {
    %c0_i32 = arith.constant 0 : i32
    %c0_i32_0 = arith.constant 0 : i32
    %c0_i32_1 = arith.constant 0 : i32
    return %arg0, %c0_i32, %c0_i32_0 : i32, i32, i32
  }
  func.func @transform_1(%arg0: i32) -> (i32, i32) {
    %c0_i32 = arith.constant 0 : i32
    %c0_i32_0 = arith.constant 0 : i32
    %c0_i32_1 = arith.constant 0 : i32
    return %c0_i32, %c0_i32_0 : i32, i32
  }
  func.func @transform_2(%arg0: i32) -> (i32, i32) {
    %c0_i32 = arith.constant 0 : i32
    %c0_i32_0 = arith.constant 0 : i32
    %c0_i32_1 = arith.constant 0 : i32
    return %c0_i32, %c0_i32_0 : i32, i32
  }
  func.func @transform_3(%arg0: i32) -> (i32, i32) {
    %c0_i32 = arith.constant 0 : i32
    %c0_i32_0 = arith.constant 0 : i32
    %c0_i32_1 = arith.constant 0 : i32
    return %c0_i32, %c0_i32_0 : i32, i32
  }
  func.func @transform_4(%arg0: i32) -> (i32, i32) {
    %c0_i32 = arith.constant 0 : i32
    %c0_i32_0 = arith.constant 0 : i32
    %c0_i32_1 = arith.constant 0 : i32
    return %c0_i32, %c0_i32_0 : i32, i32
  }
  func.func @transform_5(%arg0: i32) -> (i32, i32, i32) {
    %c0_i32 = arith.constant 0 : i32
    %c0_i32_0 = arith.constant 0 : i32
    %c0_i32_1 = arith.constant 0 : i32
    return %arg0, %c0_i32, %c0_i32_0 : i32, i32, i32
  }
}

</mosaic_0001>

<bundles_post_ra>
// kernel: tpu_custom_call.1
= control target key start
LH: loop header
LB: loop body
LE: loop exit
PB: predicated region body
PF: predicated region fallthrough
CT: control target
= control target key end

     0   :  { %s728_s0 = inlined_call_operand.hbm [shape: f32[2,4,256], index: 0, kind: input, shape index: {}]   ;;  %s729_s1 = inlined_call_operand.vmem [shape: f32[4,1], index: 1, kind: input, shape index: {}]   ;;  %s730_s2 = inlined_call_operand.<no memory space> [shape: f32[1,1], index: 2, kind: input, shape index: {}]   ;;  %s731_s3 = inlined_call_operand.vmem [shape: f32[4,1], index: 3, kind: input, shape index: {}]   ;;  %s732_s4 = inlined_call_operand.vmem [shape: f32[1,4], index: 4, kind: input, shape index: {}]   ;;  %s733_s5 = inlined_call_operand.hbm [shape: f32[2,4,256], index: 5, kind: output, shape index: {}]  }
   0x1   :  { %v10_v0 = vstv %s730_s2 }
   0x2   :  { %11 = vst [vmem:[#allocation2] sm:$0x1] %v10_v0 }
   0x3   :  { %12 = vsyncpa [#allocation4], 0 }
   0x4   :  { %14 = vsyncpa [#allocation4 + $0x1], 0 }
   0x5   :  { %15 = vsyncpa [#allocation5], 0 }
   0x6   :  { %17 = vsyncpa [#allocation5 + $0x1], 0  ;;  %s588_s20 = smov 0   ;;  %s590_s21 = smov 0  }
   0x7   :  { %s592_s22 = smov 0   ;;  %s594_s23 = smov 0  }
   0x8 LB: > { %s609_s2 = sadd.s32 4294967295, %s551_s23   ;;  %s387_s24 = sadd.s32 4294967294, %s551_s23   ;;  %s551_s23 = sphi %s594_s23, %s743_s23   ;;  %s547_s22 = sphi %s592_s22, %s742_s22   ;;  %s543_s21 = sphi %s590_s21, %s741_s21   ;;  %s539_s20 = sphi %s588_s20, %s740_s20  }
   0x9   : > { %s613_s25 = sadd.s32 1, %s551_s23   ;;  %s30_s26 = sadd.s32 1, %s547_s22 }
   0xa   : > { %s27_s27 = ssub.s32 %s551_s23, %s613_s25  ;;  %p37_p0 = scmp.ne.s32.totalorder %s547_s22, %s543_s21 }
   0xb   : > { %p28_p1 = scmp.eq.s32.totalorder %s27_s27, 0  ;;  %p38_p2 = scmp.eq.s32.totalorder %s551_s23, 0 }
   0xc   : > { %p43_p3 = scmp.ne.s32.totalorder %s543_s21, %s539_s20  ;;  %p44_p4 = scmp.eq.s32.totalorder %s609_s2, 0 }
   0xd   : > { %s625_s28 = scalar_select %p28_p1, %s547_s22, %s30_s26  }
   0xe   : > { %p627_p5 = por %p38_p2, %p37_p0  ;;  %p631_p6 = por %p44_p4, %p43_p3 }
   0xf   : > { %p151_p7 = scmp.eq.s32.totalorder %s609_s2, 1  ;;  %p157_p8 = scmp.eq.s32.totalorder %s387_s24, 1 }
  0x10   : > { %p415_p10 = scmp.lt.s32.totalorder %s551_s23, 2  ;;  %s189_s8 = sand.u32 1, %s547_s22  }
  0x11   : > { %p638_p11 = por %p151_p7, %p37_p0  ;;  %p642_p12 = por %p157_p8, %p43_p3 }
  0x12   : > { %s401_s9 = sshll.u32 %s551_s23, 3  ;;  %s390_s10 = sshll.u32 %s189_s8, 3 }
  0x13   : > { %s198_s13 = scalar_lea.hbm %s728_s0, %s401_s9  ;;  %s193_s15 = scalar_lea.vmem [#allocation3], %s390_s10 }
  0x14   : > { %s200_s14 = sshll.u32 %s198_s13, 4  ;;  %s202_s16 = sshll.u32 %s193_s15, 4  ;;  %s201_s14 = int_to_ptr.hbm [resolvable:$true] %s200_s14  ;;  %s203_s16 = int_to_ptr.vmem [resolvable:$true] %s202_s16 }
  0x15   : > { %p653_p13 = pnand %p415_p10, %p627_p5  ;;  %p393_p0 = scmp.ge.s32.totalorder %s551_s23, 1 }
  0x16   : > { %p207_p1 = scmp.lt.s32.totalorder %s551_s23, 3  ;;  %s190_s18 = scalar_lea.sflag [#allocation4], %s189_s8 }
  0x17   : > { %s455_s19 = sshra.s32 %s201_s14, 4  ;;  %p459_p3 = pneg %p653_p13  ;;  %s456_s19 = int_to_ptr.hbm [resolvable:$true] %s455_s19 }
  0x18   : > { %s457_s24 = scalar_lea.hbm %s456_s19, 8  ;;  %s462_s29 = scalar_lea.hbm %s728_s0, 16 }
  0x19   : > { %p458_p2 = scmp.ne.s32.totalorder %s456_s19, %s457_s24  ;;  %p463_p5 = scmp.lt.s32.totalorder %s456_s19, %s728_s0 }
  0x1a   : > { %p464_p8 = scmp.lt.s32.totalorder %s462_s29, %s457_s24 }
  0x1b   : > { %p460_p4 = pnand %p459_p3, %p458_p2 }
  0x1c   : > { %p465_p10 = por %p464_p8, %p463_p5 }
  0x1d   : > { %p461_p7 = pneg %p460_p4 }
  0x1f   : > { %p466_p9 = pnand %p465_p10, %p461_p7 }
  0x21   : > { %469 = shalt.err (!%p466_p9)
}
  0x22   : > { %410 = dma.hbm_to_vmem [thread:$0]  (!%p653_p13), %s201_s14, 128, %s203_s16, %s190_s18  }
  0x23   : > { %p208_p2 = pnand %p393_p0, %p207_p1 }
  0x24   : > { %s674_s8 = sand.u32 (!%p208_p2), 1, %s543_s21  }
  0x25   : > { %211 = sbr.rel (%p208_p2) target bundleno = 324 (0x144), region = 40  ;;  %s394_s11 = sshll.u32 (!%p208_p2), %s674_s8, 3 }
  0x26   : > { %s214_s12 = scalar_lea.sflag (!%p208_p2), [#allocation4], %s674_s8  ;;  %s217_s13 = scalar_lea.vmem (!%p208_p2), [#allocation3], %s394_s11 }
  0x2a   : > { %530 = dma.done.wait (%p631_p6), %s214_s12, 128  }
  0x2b   : > { %532 = vsyncadd (%p631_p6), %s214_s12, 4294967168  ;;  %v279_v1 = vlaneseq  ;;  %v245_v3 = vld [vmem:[%s217_s13] sm:$0xff]  ;;  %vm252_vm0 = vcmask 1043456   ;;  %v454_v9 = vld [vmem:[%s732_s4] ss:$0 sm:$0xff]  ;;  %v553_v10 = vmov 0  }
  0x2c   : > { %247 = vst [vmem:[#allocation1] ss:$2 sm:$0xff] %v245_v3  ;;  %452 = vset.pattern.permute.xlu1 %v553_v10  ;;  %v259_v11 = vld [vmem:[%s729_s1] sm:$0xf]  ;;  %vm261_vm1 = vcmask 3072   ;;  %s402_s19 = sshll.u32 %s609_s2, 3 }
  0x2d   : > { %v280_v2 = vshrl.u32 %v279_v1, 7  ;;  %v269_v21 = vld [vmem:[#allocation2] sm:$0x1]  ;;  %v272_v25 = vld [vmem:[%s731_s3] sm:$0xf]  ;;  %s312_s27 = scalar_lea.hbm %s733_s5, %s402_s19  ;;  %s244_s29 = scalar_lea.vmem [#allocation6], %s394_s11 }
  0x2e   : > { %v554_v32 = vmov 839922192   ;;  %s314_s9 = sshll.u32 %s244_s29, 4  ;;  %s316_s10 = sshll.u32 %s312_s27, 4  ;;  %s315_s9 = int_to_ptr.vmem [resolvable:$true] %s314_s9  ;;  %s317_s10 = int_to_ptr.hbm [resolvable:$true] %s316_s10 }
  0x2f   : > { %451 = vset.pattern.permute.xlu0 %v280_v2  ;;  %v294_v33 = vunpack.c.l.s4 %v554_v32  ;;  %s301_s12 = scalar_lea.sflag [#allocation5], %s674_s8  ;;  %s499_s13 = sshra.s32 %s317_s10, 4  ;;  %s500_s13 = int_to_ptr.hbm [resolvable:$true] %s499_s13 }
  0x30   : > { %s501_s2 = scalar_lea.hbm %s500_s13, 8  ;;  %s505_s30 = scalar_lea.hbm %s733_s5, 16 }
  0x31   : > { %v295_v34 = vunpack.c.0.s8 %v294_v33  ;;  %p502_p6 = scmp.ne.s32.totalorder %s500_s13, %s501_s2  ;;  %p506_p0 = scmp.lt.s32.totalorder %s500_s13, %s733_s5 }
  0x32   : > { %p507_p1 = scmp.lt.s32.totalorder %s505_s30, %s501_s2 }
  0x33   : > { %v248_v4 = vld.sshfl [vmem:[#allocation1] sm:$0xff pattern:$0x75316420]  ;;  %v249_v5 = vld.sshfl [vmem:[#allocation1 + $0x8] sm:$0xff pattern:$0x75316420]  ;;  %p503_p9 = pnand %p502_p6, %p638_p11 }
  0x34   : > { %v253_v6 = vsel %vm252_vm0, %v248_v4, 0.0  ;;  %v254_v7 = vsel %vm252_vm0, %v249_v5, 0.0  ;;  %p508_p3 = por %p507_p1, %p506_p0 }
  0x35   : > { %v255_v8 = vadd.f32 %v254_v7, %v253_v6  ;;  %p504_p13 = pneg %p503_p9 }
  0x37   : > { %256 = vadd.xlane.f32.xlu0 %v255_v8  ;;  %p509_p4 = pnand %p508_p3, %p504_p13 }
  0x4b   : > { %283 = vperm.xlu0 %451, %v454_v9  }
  0x53   : > { %453 = vset.pattern.permute.xlu0 %v553_v10 }
  0xaa   : > { %v257_v12 = vpop.xlane.xlu0 %256 }
  0xab   : > { %v258_v13 = vmul.f32 0.00390625, %v257_v12 }
  0xad   : > { %v260_v14 = vmul.f32 %v259_v11, %v258_v13 }
  0xaf   : > { %v262_v15 = vsel %vm261_vm1, %v260_v14, 0.0 }
  0xb0   : > { %v263_v16 = vrot.slane %v262_v15, 4 }
  0xb2   : > { %v264_v17 = vadd.f32 %v263_v16, %v262_v15 }
  0xb4   : > { %v265_v18 = vrot.slane %v264_v17, 2 }
  0xb6   : > { %v266_v19 = vadd.f32 %v265_v18, %v264_v17 }
  0xb8   : > { %v267_v20 = vrot.slane %v266_v19, 1 }
  0xba   : > { %v268_v22 = vadd.f32 %v267_v20, %v266_v19 }
  0xbc   : > { %v270_v23 = vadd.f32 %v269_v21, %v268_v22 }
  0xbd   : > { %v284_v27 = vpop.permute.xlu0 %283 }
  0xbe   : > { %v271_v24 = vmax.f32 %v270_v23, 0.0 }
  0xc0   : > { %v273_v26 = vperm.slane %v271_v24, 0 }
  0xc2   : > { %v274_v28 = vmul.f32 %v273_v26, %v272_v25 }
  0xc4   : > { %v286_v29 = vadd.f32 %v284_v27, %v274_v28 }
  0xc6   : > { %v287_v30 = vmax.f32 %v286_v29, 0.0 }
  0xc8   : > { %v288_v31 = vmin.f32 %v287_v30, 1.0 }
  0xca   : > { %291 = vperm.xlu1 %452, %v288_v31  }
 0x13c   : > { %v292_v35 = vpop.permute.xlu1 %291 }
 0x13d   : > { %v296_v36 = vperm.slane %v292_v35, %v295_v34 }
 0x13f   : > { %v298_v37 = vmul.f32 %v296_v36, %v245_v3 }
 0x141   : > { %299 = vst [vmem:[%s244_s29] sm:$0xff] %v298_v37 }
 0x142   : > { %512 = shalt.err (!%p509_p4)
}
 0x143   : > { %405 = dma.vmem_to_hbm [thread:$0]  (%p638_p11), %s315_s9, 128, %s317_s10, %s301_s12  }
 0x144 PF: > { %s328_s8 = sand.u32 1, %s539_s20   ;;  %p739_p7 = scmp.ge.s32.totalorder %s551_s23, 2 }
 0x145   : > { %s329_s17 = scalar_lea.sflag [#allocation5], %s328_s8 }
 0x146   : > { %p412_p5 = pnand %p739_p7, %p642_p12 }
 0x148   : > { %p413_p8 = pneg %p412_p5 }
 0x14a   : > { %534 = dma.done.wait (%p413_p8), %s329_s17, 128  }
 0x14b   : > { %536 = vsyncadd (%p413_p8), %s329_s17, 4294967168  ;;  %p20_p10 = scmp.ge.s32.totalorder %s613_s25, 4   ;;  %s740_s20 = smov %s543_s21 }
 0x14c   : > { %s741_s21 = smov %s547_s22  ;;  %s742_s22 = smov %s625_s28 }
 0x14d   : > { %s743_s23 = smov %s613_s25  ;;  %22 = sbr.rel (!%p20_p10) target bundleno = 8 (0x8), region = 85 }
 0x152   :  { %335 = vsyncpa [#allocation4], 1 }
 0x153   :  { %337 = vsyncpa [#allocation4 + $0x1], 1 }
 0x154   :  { %338 = vsyncpa [#allocation5], 1 }
 0x155   :  { %340 = vsyncpa [#allocation5 + $0x1], 1 }

</bundles_post_ra>
